<compile_context>
chip_gen: v7x
topology: tpu7x:2x2x1
jax: 0.10.0
libtpu: 0.0.40
codegen_flags: <defaults>
</compile_context>

<pallas_src>
import jax
import jax.numpy as jnp
from jax import lax
from jax.experimental import pallas as pl
from jax.experimental.pallas import tpu as pltpu


def _round_up(x: int, m: int) -> int:
    return (x + m - 1) // m * m


def critic_ppo_kernel(
    state_ref,   # (TB, S)      batch tile of the (padded) state
    w1t_ref,     # (H1, S)      layer-1 weight, (out, in), state-norm folded in
    b1_ref,      # (H1, 1)      layer-1 bias (column), state-norm folded in
    w2t_ref,     # (H2, H1)
    b2_ref,      # (H2, 1)
    w3t_ref,     # (1, H2)      output weight, value-re-norm folded in
    b3_ref,      # (1, 1) SMEM  scalar: b3*value_std + value_avg
    out_ref,     # (1, TB)      lane-dense value row for this batch tile
):
    x = state_ref[...]                                           # (TB, S)

    # layer 1: (H1, S) contracted with (TB, S) on S  -> (H1, TB)   (feature-major)
    h = lax.dot_general(
        w1t_ref[...], x, (((1,), (1,)), ((), ())),
        preferred_element_type=jnp.float32)
    h = jnp.maximum(h + b1_ref[...], 0.0)                        # lane-dense ReLU

    # layer 2: (H2, H1) @ (H1, TB) -> (H2, TB)
    h = lax.dot_general(
        w2t_ref[...], h, (((1,), (0,)), ((), ())),
        preferred_element_type=jnp.float32)
    h = jnp.maximum(h + b2_ref[...], 0.0)

    # output layer: (1, H2) @ (H2, TB) -> (1, TB)   (raw head, re-norm folded in)
    v = lax.dot_general(
        w3t_ref[...], h, (((1,), (0,)), ((), ())),
        preferred_element_type=jnp.float32)

    out_ref[...] = (v + b3_ref[0, 0]).astype(out_ref.dtype)


def critic_ppo_forward(state, params, *, tb_cap: int = 4096):
    """state: (B, state_dim) -> value: (B, 1) float32."""
    B, S = state.shape
    w1, b1 = params["w1"], params["b1"]          # (S, H1), (1, H1)
    w2, b2 = params["w2"], params["b2"]          # (H1, H2), (1, H2)
    w3, b3 = params["w3"], params["b3"]          # (H2, 1), (1, 1)
    s_avg, s_std = params["state_avg"], params["state_std"]   # (1, S)
    v_avg, v_std = params["value_avg"], params["value_std"]   # (1, 1)

    H1 = w1.shape[1]
    H2 = w2.shape[1]

    # --- fold normalizations into layer 1 / output layer (tiny tensors, free) ---
    inv_std = (1.0 / s_std).astype(jnp.float32)                       # (1, S)
    w1_eff = (w1 * inv_std.reshape(S, 1)).astype(jnp.float32)         # (S, H1)
    b1_eff = (b1 - (s_avg * inv_std) @ w1).astype(jnp.float32)        # (1, H1)
    w3_eff = (w3 * v_std).astype(jnp.float32)                         # (H2, 1)
    b3_eff = (b3 * v_std + v_avg).reshape(1, 1).astype(jnp.float32)   # (1, 1)

    # feature-major (out, in) weights; biases as columns so they broadcast along lanes
    w1t = w1_eff.T                         # (H1, S)
    b1c = b1_eff.reshape(H1, 1)
    w2t = w2.astype(jnp.float32).T         # (H2, H1)
    b2c = b2.reshape(H2, 1).astype(jnp.float32)
    w3t = w3_eff.T                         # (1, H2)

    # --- batch tiling: TB multiple of 128, capped for VMEM headroom (v7x: 32 MiB scoped) ---
    TB = min(tb_cap, _round_up(B, 128))
    B_pad = _round_up(B, TB)
    if B_pad != B:
        state = jnp.pad(state, ((0, B_pad - B), (0, 0)))
    n_tiles = B_pad // TB

    out_row = pl.pallas_call(
        critic_ppo_kernel,
        out_shape=jax.ShapeDtypeStruct((1, B_pad), jnp.float32),
        grid=(n_tiles,),
        in_specs=[
            pl.BlockSpec((TB, S), lambda i: (i, 0)),               # state: tiled over batch
            pl.BlockSpec((H1, S), lambda i: (0, 0)),               # weights: resident
            pl.BlockSpec((H1, 1), lambda i: (0, 0)),
            pl.BlockSpec((H2, H1), lambda i: (0, 0)),
            pl.BlockSpec((H2, 1), lambda i: (0, 0)),
            pl.BlockSpec((1, H2), lambda i: (0, 0)),
            pl.BlockSpec(memory_space=pltpu.MemorySpace.SMEM),     # folded output bias scalar
        ],
        out_specs=pl.BlockSpec((1, TB), lambda i: (0, i)),         # lane-dense output row
        compiler_params=pltpu.CompilerParams(
            dimension_semantics=("parallel",)),                    # megacore on v7x
    )(state, w1t, b1c, w2t, b2c, w3t, b3_eff)

    # layout plumbing back to the module's (B, 1) contract
    return out_row[0, :B].reshape(B, 1)


def make_params(key, state_dim, dims):
    """Synthetic parameters matching CriticPPO([*dims], state_dim, action_dim)."""
    sizes = [state_dim, *dims, 1]
    keys = jax.random.split(key, len(sizes) + 1)
    params = {}
    for i, (fan_in, fan_out) in enumerate(zip(sizes[:-1], sizes[1:])):
        std = 0.5 if i == len(sizes) - 2 else 1.0
        w = jax.random.normal(keys[i], (fan_in, fan_out), jnp.float32) * std / jnp.sqrt(fan_in)
        if i == len(sizes) - 2:
            b = jnp.full((1, fan_out), 1e-6, jnp.float32)   # layer_init_with_orthogonal bias
        else:
            b = jnp.zeros((1, fan_out), jnp.float32)
        params[f"w{i + 1}"] = w
        params[f"b{i + 1}"] = b
    # non-trainable normalization buffers (non-trivial values to exercise the folding)
    params["state_avg"] = 0.1 * jax.random.normal(keys[-2], (1, state_dim), jnp.float32)
    params["state_std"] = 0.5 + jax.random.uniform(keys[-1], (1, state_dim), jnp.float32)
    params["value_avg"] = jnp.full((1, 1), 0.3, jnp.float32)
    params["value_std"] = jnp.full((1, 1), 1.7, jnp.float32)
    return params


def reference_forward(state, params):
    x = (state - params["state_avg"]) / params["state_std"]
    h = jnp.maximum(x @ params["w1"] + params["b1"], 0.0)
    h = jnp.maximum(h @ params["w2"] + params["b2"], 0.0)
    v = h @ params["w3"] + params["b3"]
    return v * params["value_std"] + params["value_avg"]


if __name__ == "__main__":
    key = jax.random.PRNGKey(0)
    state_dim = 16
    dims = [32, 32]

    k_param, k_s1, k_s2 = jax.random.split(key, 3)
    params = make_params(k_param, state_dim, dims)

    # small batch (exercises the padding path: 8 -> 128, single tile)
    state_small = jax.random.normal(k_s1, (8, state_dim), jnp.float32)
    out_small = jax.block_until_ready(critic_ppo_forward(state_small, params))
    ref_small = reference_forward(state_small, params)
    assert out_small.shape == (8, 1)
    assert jnp.allclose(out_small, ref_small, atol=1e-4, rtol=1e-4)

    # larger batch (exercises multi-tile grid + parallel batch axis: 5000 -> 2 x 4096 tiles)
    state_big = jax.random.normal(k_s2, (5000, state_dim), jnp.float32)
    out_big = jax.block_until_ready(critic_ppo_forward(state_big, params))
    ref_big = reference_forward(state_big, params)
    assert out_big.shape == (5000, 1)
    assert jnp.allclose(out_big, ref_big, atol=1e-4, rtol=1e-4)

    print("KERNEL_OK")
</pallas_src>

<mosaic_0001>
module attributes {stable_mosaic.version = 11 : i64} {
  func.func @critic_ppo_kernel(%arg0: i32, %arg1: memref<128x16xf32, #tpu.memory_space<vmem>>, %arg2: memref<32x16xf32, #tpu.memory_space<vmem>>, %arg3: memref<32x1xf32, #tpu.memory_space<vmem>>, %arg4: memref<32x32xf32, #tpu.memory_space<vmem>>, %arg5: memref<32x1xf32, #tpu.memory_space<vmem>>, %arg6: memref<1x32xf32, #tpu.memory_space<vmem>>, %arg7: memref<1x1xf32, #tpu.memory_space<smem>>, %arg8: memref<1x128xf32, #tpu.memory_space<vmem>>) attributes {dimension_semantics = [#tpu.dimension_semantics<parallel>], iteration_bounds = array<i64: 1>, scalar_prefetch = 0 : i64, scratch_operands = 0 : i64, tpu.core_type = #tpu.core_type<tc>, window_params = [{transform_indices = @transform_0, window_bounds = array<i64: 128, 16>}, {pipeline_mode = #tpu.pipeline_mode<synchronous>, transform_indices = @transform_1, window_bounds = array<i64: 32, 16>}, {pipeline_mode = #tpu.pipeline_mode<synchronous>, transform_indices = @transform_2, window_bounds = array<i64: 32, 1>}, {pipeline_mode = #tpu.pipeline_mode<synchronous>, transform_indices = @transform_3, window_bounds = array<i64: 32, 32>}, {pipeline_mode = #tpu.pipeline_mode<synchronous>, transform_indices = @transform_4, window_bounds = array<i64: 32, 1>}, {pipeline_mode = #tpu.pipeline_mode<synchronous>, transform_indices = @transform_5, window_bounds = array<i64: 1, 32>}, {transform_indices = @transform_6, window_bounds = array<i64: 1, 1>}, {transform_indices = @transform_7, window_bounds = array<i64: 1, 128>}]} {
    %c0 = arith.constant 0 : index
    %c0_0 = arith.constant 0 : index
    %0 = vector.load %arg1[%c0, %c0_0] : memref<128x16xf32, #tpu.memory_space<vmem>>, vector<128x16xf32>
    %c0_1 = arith.constant 0 : index
    %c0_2 = arith.constant 0 : index
    %1 = vector.load %arg2[%c0_1, %c0_2] : memref<32x16xf32, #tpu.memory_space<vmem>>, vector<32x16xf32>
    %cst = arith.constant dense<0.000000e+00> : vector<32x128xf32>
    %2 = tpu.matmul %1, %0, %cst {dimension_numbers = #tpu.dot_dimension_numbers<[1], [1], [0], [0], [0, 0, 1, 0], [], []>} : vector<32x16xf32>, vector<128x16xf32>, vector<32x128xf32> -> vector<32x128xf32>
    %c0_3 = arith.constant 0 : index
    %c0_4 = arith.constant 0 : index
    %3 = vector.load %arg3[%c0_3, %c0_4] : memref<32x1xf32, #tpu.memory_space<vmem>>, vector<32x1xf32>
    %4 = vector.broadcast %3 : vector<32x1xf32> to vector<32x128xf32>
    %5 = arith.addf %2, %4 : vector<32x128xf32>
    %cst_5 = arith.constant 0.000000e+00 : f32
    %6 = vector.broadcast %cst_5 : f32 to vector<32x128xf32>
    %7 = arith.maximumf %5, %6 : vector<32x128xf32>
    %c0_6 = arith.constant 0 : index
    %c0_7 = arith.constant 0 : index
    %8 = vector.load %arg4[%c0_6, %c0_7] : memref<32x32xf32, #tpu.memory_space<vmem>>, vector<32x32xf32>
    %cst_8 = arith.constant dense<0.000000e+00> : vector<32x128xf32>
    %9 = tpu.matmul %8, %7, %cst_8 {dimension_numbers = #tpu.dot_dimension_numbers<[1], [0], [0], [1], [0, 0, 1, 1], [], []>} : vector<32x32xf32>, vector<32x128xf32>, vector<32x128xf32> -> vector<32x128xf32>
    %c0_9 = arith.constant 0 : index
    %c0_10 = arith.constant 0 : index
    %10 = vector.load %arg5[%c0_9, %c0_10] : memref<32x1xf32, #tpu.memory_space<vmem>>, vector<32x1xf32>
    %11 = vector.broadcast %10 : vector<32x1xf32> to vector<32x128xf32>
    %12 = arith.addf %9, %11 : vector<32x128xf32>
    %cst_11 = arith.constant 0.000000e+00 : f32
    %13 = vector.broadcast %cst_11 : f32 to vector<32x128xf32>
    %14 = arith.maximumf %12, %13 : vector<32x128xf32>
    %c0_12 = arith.constant 0 : index
    %c0_13 = arith.constant 0 : index
    %15 = vector.load %arg6[%c0_12, %c0_13] : memref<1x32xf32, #tpu.memory_space<vmem>>, vector<1x32xf32>
    %cst_14 = arith.constant dense<0.000000e+00> : vector<1x128xf32>
    %16 = tpu.matmul %15, %14, %cst_14 {dimension_numbers = #tpu.dot_dimension_numbers<[1], [0], [0], [1], [0, 0, 1, 1], [], []>} : vector<1x32xf32>, vector<32x128xf32>, vector<1x128xf32> -> vector<1x128xf32>
    %c0_15 = arith.constant 0 : index
    %c0_16 = arith.constant 0 : index
    %17 = memref.load %arg7[%c0_15, %c0_16] : memref<1x1xf32, #tpu.memory_space<smem>>
    %18 = vector.broadcast %17 : f32 to vector<1x128xf32>
    %19 = arith.addf %16, %18 : vector<1x128xf32>
    %c0_17 = arith.constant 0 : index
    %c0_18 = arith.constant 0 : index
    %20 = vector.load %arg8[%c0_17, %c0_18] : memref<1x128xf32, #tpu.memory_space<vmem>>, vector<1x128xf32>
    tpu.vector_store %arg8[%c0_17, %c0_18], %19 {strides = array<i32>} : memref<1x128xf32, #tpu.memory_space<vmem>>, vector<1x128xf32>,
    return
  }
  func.func @transform_0(%arg0: i32) -> (i32, i32) {
    %c0_i32 = arith.constant 0 : i32
    %c0_i32_0 = arith.constant 0 : i32
    return %arg0, %c0_i32 : i32, i32
  }
  func.func @transform_1(%arg0: i32) -> (i32, i32) {
    %c0_i32 = arith.constant 0 : i32
    %c0_i32_0 = arith.constant 0 : i32
    %c0_i32_1 = arith.constant 0 : i32
    return %c0_i32, %c0_i32_0 : i32, i32
  }
  func.func @transform_2(%arg0: i32) -> (i32, i32) {
    %c0_i32 = arith.constant 0 : i32
    %c0_i32_0 = arith.constant 0 : i32
    %c0_i32_1 = arith.constant 0 : i32
    return %c0_i32, %c0_i32_0 : i32, i32
  }
  func.func @transform_3(%arg0: i32) -> (i32, i32) {
    %c0_i32 = arith.constant 0 : i32
    %c0_i32_0 = arith.constant 0 : i32
    %c0_i32_1 = arith.constant 0 : i32
    return %c0_i32, %c0_i32_0 : i32, i32
  }
  func.func @transform_4(%arg0: i32) -> (i32, i32) {
    %c0_i32 = arith.constant 0 : i32
    %c0_i32_0 = arith.constant 0 : i32
    %c0_i32_1 = arith.constant 0 : i32
    return %c0_i32, %c0_i32_0 : i32, i32
  }
  func.func @transform_5(%arg0: i32) -> (i32, i32) {
    %c0_i32 = arith.constant 0 : i32
    %c0_i32_0 = arith.constant 0 : i32
    %c0_i32_1 = arith.constant 0 : i32
    return %c0_i32, %c0_i32_0 : i32, i32
  }
  func.func @transform_6(%arg0: i32) -> (i32, i32) {
    %c0_i32 = arith.constant 0 : i32
    %c0_i32_0 = arith.constant 0 : i32
    %c0_i32_1 = arith.constant 0 : i32
    return %c0_i32, %c0_i32_0 : i32, i32
  }
  func.func @transform_7(%arg0: i32) -> (i32, i32) {
    %c0_i32 = arith.constant 0 : i32
    %c0_i32_0 = arith.constant 0 : i32
    return %c0_i32, %arg0 : i32, i32
  }
}

</mosaic_0001>

<bundles_post_ra>
// kernel: tpu_custom_call.1
= control target key start
LH: loop header
LB: loop body
LE: loop exit
PB: predicated region body
PF: predicated region fallthrough
CT: control target
= control target key end

     0   :  { %vm72_vm0 = vcmask 130048   ;;  %v657_v6 = vmov 0   ;;  %s863_s0 = inlined_call_operand.vmem [shape: f32[128,16], index: 0, kind: input, shape index: {}]   ;;  %s864_s1 = inlined_call_operand.vmem [shape: f32[32,16], index: 1, kind: input, shape index: {}]   ;;  %s865_s2 = inlined_call_operand.vmem [shape: f32[32,1], index: 2, kind: input, shape index: {}]   ;;  %s866_s3 = inlined_call_operand.vmem [shape: f32[32,32], index: 3, kind: input, shape index: {}]   ;;  %s867_s4 = inlined_call_operand.vmem [shape: f32[32,1], index: 4, kind: input, shape index: {}]   ;;  %s868_s5 = inlined_call_operand.vmem [shape: f32[1,32], index: 5, kind: input, shape index: {}]   ;;  %s869_s6 = inlined_call_operand.<no memory space> [shape: f32[1,1], index: 6, kind: input, shape index: {}]   ;;  %s870_s7 = inlined_call_operand.hbm [shape: f32[1,128], index: 7, kind: output, shape index: {}]  }
   0x1   :  { %v28_v0 = vld [vmem:[%s863_s0] sm:$0xff]  ;;  %v29_v1 = vld [vmem:[%s863_s0 + $0x8] sm:$0xff]  ;;  %v30_v2 = vld [vmem:[%s863_s0 + $0x10] sm:$0xff]  ;;  %631 = vset.pattern.permute.xlu0 %v657_v6  ;;  %632 = vset.pattern.permute.xlu1 %v657_v6 }
   0x2   :  { %v564_v3 = vpack.c.bf16 %v29_v1, %v28_v0  ;;  %vm713_vm1 = vmpackc.low %vm72_vm0, %vm72_vm0  ;;  %v31_v5 = vld [vmem:[%s863_s0 + $0x18] sm:$0xff]  ;;  %v44_v8 = vld [vmem:[%s864_s1] sm:$0xff] }
   0x3   :  { %v570_v7 = vpack.c.bf16 %v31_v5, %v30_v2  ;;  %v32_v9 = vld [vmem:[%s863_s0 + $0x20] sm:$0xff]  ;;  %v33_v10 = vld [vmem:[%s863_s0 + $0x28] sm:$0xff]  ;;  %533 = vmatprep.mubr.msk.f32.mxu0 %vm72_vm0, %v44_v8  ;;  %v50_v12 = vld [vmem:[%s865_s2 + $0x10] sm:$0xff] }
   0x4   :  { %566 = vmatprep.subr.msk.bf16.mxu0 %vm713_vm1, %v564_v3  ;;  %v48_v11 = vld [vmem:[%s865_s2] sm:$0xff]  ;;  %64 = vperm.xlu1 %632, %v50_v12   ;;  %v576_v13 = vpack.c.bf16 %v33_v10, %v32_v9  ;;  %v49_v14 = vld [vmem:[%s865_s2 + $0x8] sm:$0xff] }
   0x5   :  { %569 = vmatpush3.bf16.xpose.msk.msra.mxu0 %vm713_vm1, %v564_v3  ;;  %54 = vperm.xlu0 %631, %v48_v11  }
   0x6   :  { %572 = vmatprep.subr.msk.bf16.mxu0 %vm713_vm1, %v570_v7 }
   0x7   :  { %13 = vsyncpa [#allocation4], 0  ;;  %v51_v15 = vld [vmem:[%s865_s2 + $0x18] sm:$0xff]  ;;  %v226_v16 = vld [vmem:[%s867_s4] sm:$0xff]  ;;  %vm250_vm2 = vcmask 261120   ;;  %v658_v60 = vmov 0.0|0.0  }
   0x8   :  { %69 = vperm.xlu1 %632, %v51_v15   ;;  %v34_v17 = vld [vmem:[%s863_s0 + $0x30] sm:$0xff]  ;;  %v35_v18 = vld [vmem:[%s863_s0 + $0x38] sm:$0xff]  ;;  %v227_v19 = vld [vmem:[%s867_s4 + $0x8] sm:$0xff]  ;;  %vm659_vm3 = vmmov 0   ;;  %v660_v61 = vmov 0.0   ;;  %s661_s16 = smov [#allocation3]  }
   0x9   :  { %59 = vperm.xlu0 %631, %v49_v14   ;;  %v582_v20 = vpack.c.bf16 %v35_v18, %v34_v17  ;;  %v228_v21 = vld [vmem:[%s867_s4 + $0x10] sm:$0xff]  ;;  %v229_v22 = vld [vmem:[%s867_s4 + $0x18] sm:$0xff]  ;;  %v36_v23 = vld [vmem:[%s863_s0 + $0x40] sm:$0xff]  ;;  %v354_v17 = vstv %s869_s6  ;;  %s435_s17 = sshll.u32 %s661_s16, 4  ;;  %s436_s17 = int_to_ptr.vmem [resolvable:$true] %s435_s17 }
   0xa   :  { %v37_v24 = vld [vmem:[%s863_s0 + $0x48] sm:$0xff]  ;;  %v38_v26 = vld [vmem:[%s863_s0 + $0x50] sm:$0xff]  ;;  %v39_v27 = vld [vmem:[%s863_s0 + $0x58] sm:$0xff]  ;;  %s633_s18 = scalar_lea.vmem %s436_s17, 16  ;;  %s637_s19 = scalar_lea.vmem %s436_s17, 32 }
   0xb   :  { %v588_v25 = vpack.c.bf16 %v37_v24, %v36_v23  ;;  %v594_v28 = vpack.c.bf16 %v39_v27, %v38_v26  ;;  %v40_v29 = vld [vmem:[%s863_s0 + $0x60] sm:$0xff]  ;;  %v41_v30 = vld [vmem:[%s863_s0 + $0x68] sm:$0xff]  ;;  %v42_v32 = vld [vmem:[%s863_s0 + $0x70] sm:$0xff]  ;;  %p634_p0 = scmp.ne.s32.totalorder %s436_s17, %s633_s18  ;;  %p638_p1 = scmp.lt.s32.totalorder %s436_s17, %s436_s17 }
   0xc   :  { %237 = vperm.xlu1 %632, %v227_v19   ;;  %v600_v31 = vpack.c.bf16 %v41_v30, %v40_v29  ;;  %v43_v33 = vld [vmem:[%s863_s0 + $0x78] sm:$0xff]  ;;  %v45_v35 = vld [vmem:[%s864_s1 + $0x8] sm:$0xff]  ;;  %v46_v36 = vld [vmem:[%s864_s1 + $0x10] sm:$0xff]  ;;  %p639_p2 = scmp.lt.s32.totalorder %s637_s19, %s633_s18 }
   0xd   :  { %575 = vmatpush3.bf16.xpose.msk.msra.mxu0 %vm713_vm1, %v570_v7  ;;  %232 = vperm.xlu0 %631, %v226_v16   ;;  %v606_v34 = vpack.c.bf16 %v43_v33, %v42_v32  ;;  %v47_v37 = vld [vmem:[%s864_s1 + $0x18] sm:$0xff]  ;;  %v222_v38 = vld [vmem:[%s866_s3] sm:$0xff]  ;;  %v223_v57 = vld [vmem:[%s866_s3 + $0x8] sm:$0xff] }
   0xe   :  { %578 = vmatprep.subr.msk.bf16.mxu0 %vm713_vm1, %v576_v13  ;;  %547 = vmatprep.mubr.msk.f32.mxu1 %vm250_vm2, %v222_v38  ;;  %v224_v58 = vld [vmem:[%s866_s3 + $0x10] sm:$0xff]  ;;  %v225_v59 = vld [vmem:[%s866_s3 + $0x18] sm:$0xff]  ;;  %v352_v16 = vld [vmem:[%s868_s5] sm:$0x1]  ;;  %p640_p3 = por %p639_p2, %p638_p1 }
  0x10   :  { %247 = vperm.xlu1 %632, %v229_v22   ;;  %p641_p4 = pnand %p640_p3, %p634_p0 }
  0x11   :  { %242 = vperm.xlu0 %631, %v228_v21  }
  0x15   :  { %581 = vmatpush3.bf16.xpose.msk.msra.mxu0 %vm713_vm1, %v576_v13 }
  0x16   :  { %584 = vmatprep.subr.msk.bf16.mxu0 %vm713_vm1, %v582_v20 }
  0x1d   :  { %587 = vmatpush3.bf16.xpose.msk.msra.mxu0 %vm713_vm1, %v582_v20 }
  0x1e   :  { %590 = vmatprep.subr.msk.bf16.mxu0 %vm713_vm1, %v588_v25 }
  0x25   :  { %593 = vmatpush3.bf16.xpose.msk.msra.mxu0 %vm713_vm1, %v588_v25 }
  0x26   :  { %596 = vmatprep.subr.msk.bf16.mxu0 %vm713_vm1, %v594_v28 }
  0x2d   :  { %599 = vmatpush3.bf16.xpose.msk.msra.mxu0 %vm713_vm1, %v594_v28 }
  0x2e   :  { %602 = vmatprep.subr.msk.bf16.mxu0 %vm713_vm1, %v600_v31 }
  0x35   :  { %605 = vmatpush3.bf16.xpose.msk.msra.mxu0 %vm713_vm1, %v600_v31 }
  0x36   :  { %608 = vmatprep.subr.msk.bf16.mxu0 %vm713_vm1, %v606_v34 }
  0x3d   :  { %611 = vmatpush3.bf16.xpose.msk.msra.mxu0 %vm713_vm1, %v606_v34 }
  0x44   :  { %534 = vmatmul.mubr.msk.f32.vlgmr.msra.gmra.mrb[0].mxu0 %vm72_vm0, %v45_v35 }
  0x45   :  { %536 = vmatprep.mubr.msk.f32.mxu0 %vm72_vm0, %v46_v36 }
  0x48   :  { %537 = vmatmul.mubr.msk.f32.gmra.mrb[2].mxu0 %vm72_vm0, %v47_v37 }
  0x83   :  { %v65_v40 = vpop.permute.xlu1 %64 }
  0x84   :  { %v55_v39 = vpop.permute.xlu0 %54 }
  0x87   :  { %v70_v47 = vpop.permute.xlu1 %69 }
  0x88   :  { %v60_v41 = vpop.permute.xlu0 %59 }
  0x8b   :  { %v238_v62 = vpop.permute.xlu1 %237 }
  0x8c   :  { %v233_v63 = vpop.permute.xlu0 %232 }
  0x8f   :  { %v248_v5 = vpop.permute.xlu1 %247 }
  0x90   :  { %v243_v8 = vpop.permute.xlu0 %242 }
 0x117   :  { %v535_v42 = vpop.f32.mrb[0].mxu0 }
 0x118   :  { %v205_v43 = vadd.f32 %v535_v42, %v60_v41  ;;  %v199_v44 = vpop.f32.mrb[1].mxu0 }
 0x119   :  { %v200_v45 = vadd.f32 %v199_v44, %v55_v39 }
 0x11a   :  { %v219_v46 = vmax.f32 %v205_v43, 0.0 }
 0x11b   :  { %v218_v48 = vmax.f32 %v200_v45, 0.0  ;;  %v538_v49 = vpop.f32.mrb[2].mxu0 }
 0x11c   :  { %v215_v50 = vadd.f32 %v538_v49, %v70_v47  ;;  %v209_v51 = vpop.f32.mrb[3].mxu0 }
 0x11d   :  { %v210_v52 = vadd.f32 %v209_v51, %v65_v40  ;;  %v612_v53 = vpack.c.bf16 %v219_v46, %v218_v48 }
 0x11e   :  { %v221_v54 = vmax.f32 %v215_v50, 0.0 }
 0x11f   :  { %v220_v55 = vmax.f32 %v210_v52, 0.0  ;;  %613 = vmatprep.subr.bf16.mxu1 %v612_v53 }
 0x120   :  { %615 = vmatpush3.bf16.msra.mxu1 %v612_v53 }
 0x121   :  { %v616_v56 = vpack.c.bf16 %v221_v54, %v220_v55 }
 0x123   :  { %617 = vmatprep.subr.bf16.mxu1 %v616_v56 }
 0x124   :  { %619 = vmatpush3.bf16.msra.mxu1 %v616_v56 }
 0x125   :  { %620 = vmatprep.subr.bf16.mxu1 %v658_v60 }
 0x127   :  { %548 = vmatmul.mubr.msk.f32.vlgmr.msra.gmra.mrb[0].mxu1 %vm250_vm2, %v223_v57 }
 0x128   :  { %550 = vmatprep.mubr.msk.f32.mxu1 %vm250_vm2, %v224_v58 }
 0x12b   :  { %551 = vmatmul.mubr.msk.f32.gmra.mrb[2].mxu1 %vm250_vm2, %v225_v59 }
 0x12c   :  { %561 = vmatprep.mubr.msk.f32.mxu1 %vm659_vm3, %v660_v61 }
 0x1fa   :  { %v549_v0 = vpop.f32.mrb[0].mxu1 }
 0x1fb   :  { %v335_v1 = vadd.f32 %v549_v0, %v238_v62  ;;  %v329_v2 = vpop.f32.mrb[1].mxu1 }
 0x1fc   :  { %v330_v3 = vadd.f32 %v329_v2, %v233_v63 }
 0x1fd   :  { %v349_v4 = vmax.f32 %v335_v1, 0.0 }
 0x1fe   :  { %v348_v6 = vmax.f32 %v330_v3, 0.0  ;;  %v552_v7 = vpop.f32.mrb[2].mxu1 }
 0x1ff   :  { %v345_v9 = vadd.f32 %v552_v7, %v248_v5  ;;  %v339_v10 = vpop.f32.mrb[3].mxu1 }
 0x200   :  { %v621_v11 = vpack.c.bf16 %v349_v4, %v348_v6  ;;  %v340_v12 = vadd.f32 %v339_v10, %v243_v8 }
 0x201   :  { %v351_v13 = vmax.f32 %v345_v9, 0.0 }
 0x202   :  { %v350_v14 = vmax.f32 %v340_v12, 0.0  ;;  %622 = vmatpush3.bf16.msra.mxu1 %v621_v11 }
 0x203   :  { %623 = vmatprep.subr.bf16.mxu1 %v658_v60 }
 0x204   :  { %v624_v15 = vpack.c.bf16 %v351_v13, %v350_v14 }
 0x206   :  { %625 = vmatpush3.bf16.msra.mxu1 %v624_v15 }
 0x209   :  { %562 = vmatmul.mubr.msk.f32.vlgmr.msra.gmra.mrb[4].mxu1 %vm250_vm2, %v352_v16 }
 0x2dc   :  { %v424_v18 = vpop.f32.mrb[4].mxu1 }
 0x2dd   :  { %v425_v19 = vadd.f32 %v424_v18, %v354_v17  ;;  %v563_v20 = vpop.f32.mrb[5].mxu1 }
 0x2df   :  { %428 = vst [vmem:[#allocation3] sm:$0x1] %v425_v19 }
 0x2e0   :  { %644 = shalt.err (!%p641_p4)
}
 0x2e1   :  { %s645_s21 = scalar_lea.hbm %s870_s7, 16 }
 0x2e2   :  { %p646_p5 = scmp.ne.s32.totalorder %s870_s7, %s645_s21  ;;  %p649_p6 = scmp.lt.u32.totalorder %s645_s21, %s870_s7 }
 0x2e4   :  { %p651_p7 = pnand %p649_p6, %p646_p5 }
 0x2e6   :  { %654 = shalt.err (!%p651_p7)
}
 0x2e7   :  { %438 = dma.vmem_to_hbm [thread:$0]  %s436_s17, 16, %s870_s7, [#allocation4]  }
 0x2e8   :  { %655 = dma.done.wait [#allocation4], 16  }
 0x2e9   :  { %656 = vsyncadd [#allocation4], 4294967280 }
 0x2ea   :  { %442 = vsyncpa [#allocation4], 1 }

</bundles_post_ra>
